<compile_context>
chip_gen: v7x
topology: tpu7x:2x2x1
jax: 0.10.0
libtpu: 0.0.40
codegen_flags: <defaults>
</compile_context>

<pallas_src>
import functools

import jax
import jax.numpy as jnp
from jax.experimental import pallas as pl
from jax.experimental.pallas import tpu as pltpu


# --------------------------------------------------------------------------- #
# Kernel
# --------------------------------------------------------------------------- #
def _block_kernel(x_ref, w_ref, b_ref, o_ref, *, compute_dtype):
    # x_ref: (TM, C_in) row tile (input dtype, e.g. f32)
    # w_ref: (C_in, TN)  pre-transposed weight panel (already in operand dtype)
    # b_ref: (1, TN)     bias panel, f32
    # o_ref: (TM, TN)    output tile
    x = x_ref[...]
    if compute_dtype is not None and x.dtype != compute_dtype:
        x = x.astype(compute_dtype)          # in-kernel cast: no extra HBM pass
    y = jnp.dot(x, w_ref[...], preferred_element_type=jnp.float32)  # MXU, f32 acc
    y = y + b_ref[...]                       # f32 bias broadcast over rows
    o_ref[...] = jnp.maximum(y, 0.0).astype(o_ref.dtype)            # ReLU


# --------------------------------------------------------------------------- #
# Helpers
# --------------------------------------------------------------------------- #
def _round_up(n, m):
    return ((n + m - 1) // m) * m


def _vmem_capacity_bytes():
    """Physical per-core VMEM; fall back to the smallest (v7x: 64 MiB)."""
    try:
        return int(pltpu.get_tpu_info().vmem_capacity_bytes)
    except Exception:
        return 64 << 20


def prepare_block_params(weight, bias, *, use_bf16_operands=False):
    """One-time (cacheable) parameter transforms.

    weight: (C_out, C_in) PyTorch nn.Linear layout.
    Returns (w_t, b2d): w_t is (C_in, C_out) in the operand dtype, b2d is (1, C_out) f32.
    Do this once at parameter-setup time and reuse across forward calls.
    bf16 operands are recommended on v5e as well as v6e/v7x (f32 accumulate).
    """
    weight = jnp.asarray(weight)
    bias = jnp.asarray(bias)
    op_dtype = jnp.bfloat16 if use_bf16_operands else weight.dtype
    w_t = weight.T.astype(op_dtype)                      # (C_in, C_out), no in-kernel transpose
    b2d = bias.astype(jnp.float32).reshape(1, -1)        # (1, C_out)
    return w_t, b2d


# --------------------------------------------------------------------------- #
# Forward
# --------------------------------------------------------------------------- #
def block_apply(x, w_t, b2d, *, tm=512, out_dtype=None):
    """ReLU(x @ w_t + b2d) with w_t = weight.T already prepared/cast."""
    orig_shape = x.shape
    C_in, C_out = w_t.shape
    x2d = x.reshape(-1, C_in)
    M = x2d.shape[0]

    out_dtype = out_dtype if out_dtype is not None else x.dtype
    compute_dtype = w_t.dtype if x2d.dtype != w_t.dtype else None

    op_bytes = jnp.dtype(w_t.dtype).itemsize
    x_bytes = jnp.dtype(x2d.dtype).itemsize
    out_bytes = jnp.dtype(out_dtype).itemsize

    # ---- generation-aware VMEM budget --------------------------------------
    phys = _vmem_capacity_bytes()                 # 128 MiB v5e/v6e, 64 MiB v7x
    budget = max(16 << 20, phys - (16 << 20))     # leave headroom for Mosaic scratch

    rows = _round_up(max(M, 1), 8)
    TM_FLOOR = 256

    def _tm_cap(tn):
        w_bufs = 1 if tn >= C_out else 2          # constant panel -> single buffer
        fixed = w_bufs * C_in * tn * op_bytes + 2 * tn * 4
        per_row = 2 * C_in * x_bytes + 2 * tn * out_bytes
        return (budget - fixed) // per_row

    # Prefer shrinking the weight panel (N tiling) over collapsing the row tile.
    tn = C_out
    while _tm_cap(tn) < TM_FLOOR and tn > 128:
        tn = max(128, _round_up(tn // 2, 128))

    cap = max(8, (int(_tm_cap(tn)) // 8) * 8)
    tm_eff = max(8, min(tm, rows, cap))
    tm_eff = max(8, (tm_eff // 8) * 8)

    grid_m = pl.cdiv(M, tm_eff)
    # v7x has 2 TensorCores; give the parallel row axis at least 2 steps.
    if grid_m < 2 and M > 8:
        tm_eff = max(8, _round_up(pl.cdiv(rows, 2), 8))
        grid_m = pl.cdiv(M, tm_eff)
    grid_n = pl.cdiv(C_out, tn)

    # ---- VMEM limit (only when the footprint is large) ----------------------
    w_bufs = 1 if grid_n == 1 else 2
    needed = (w_bufs * C_in * tn * op_bytes + 2 * tn * 4
              + 2 * tm_eff * C_in * x_bytes
              + 2 * tm_eff * tn * out_bytes)
    vmem_limit = None
    if needed > (12 << 20):
        vmem_limit = int(min(needed + (8 << 20), phys - (8 << 20)))
        if vmem_limit < needed:
            vmem_limit = int(needed + (2 << 20))

    cost = pl.CostEstimate(
        flops=2 * M * C_in * C_out,
        transcendentals=0,
        bytes_accessed=(grid_n * M * C_in * x_bytes      # x (re-read per N panel)
                        + C_in * C_out * op_bytes        # weight (read once)
                        + C_out * 4                      # bias
                        + M * C_out * out_bytes),        # output
    )

    const_mode = pl.Buffered(1) if grid_n == 1 else pl.Buffered(2)
    kernel = functools.partial(_block_kernel, compute_dtype=compute_dtype)

    out = pl.pallas_call(
        kernel,
        out_shape=jax.ShapeDtypeStruct((M, C_out), out_dtype),
        grid_spec=pltpu.PrefetchScalarGridSpec(
            num_scalar_prefetch=0,
            # Outer axis over weight panels (usually 1), inner axis streams rows,
            # so each weight panel is DMA'd from HBM exactly once.
            grid=(grid_n, grid_m),
            in_specs=[
                pl.BlockSpec((tm_eff, C_in), lambda j, i: (i, 0)),
                pl.BlockSpec((C_in, tn), lambda j, i: (0, j),
                             pipeline_mode=const_mode),
                pl.BlockSpec((1, tn), lambda j, i: (0, j),
                             pipeline_mode=const_mode),
            ],
            out_specs=pl.BlockSpec((tm_eff, tn), lambda j, i: (i, j)),
        ),
        compiler_params=pltpu.CompilerParams(
            dimension_semantics=("parallel", "parallel"),
            vmem_limit_bytes=vmem_limit,
        ),
        cost_estimate=cost,
    )(x2d, w_t, b2d)

    return out.reshape(orig_shape[:-1] + (C_out,))


def block_forward(x, weight, bias, *, tm=512, use_bf16_operands=False, out_dtype=None):
    """Convenience wrapper: ReLU(x @ weight^T + bias) with PyTorch-layout weight.

    For repeated calls, prefer prepare_block_params(...) once + block_apply(...)
    so the weight transpose/cast and bias reshape are not repeated per forward.
    """
    w_t, b2d = prepare_block_params(weight, bias, use_bf16_operands=use_bf16_operands)
    return block_apply(x, w_t, b2d, tm=tm, out_dtype=out_dtype)


# --------------------------------------------------------------------------- #
# Demo / correctness check
# --------------------------------------------------------------------------- #
if __name__ == "__main__":
    channels = 128          # lane-dense, (8,128)-friendly
    batch, seq = 2, 8

    key = jax.random.PRNGKey(0)
    kx, kw, kb = jax.random.split(key, 3)

    x = jax.random.normal(kx, (batch, seq, channels), dtype=jnp.float32)
    # PyTorch nn.Linear init style: uniform(-1/sqrt(fan_in), 1/sqrt(fan_in))
    bound = 1.0 / (channels ** 0.5)
    weight = jax.random.uniform(kw, (channels, channels), jnp.float32, -bound, bound)
    bias = jax.random.uniform(kb, (channels,), jnp.float32, -bound, bound)

    # Reference (same semantics as PyTorch Linear + ReLU).
    ref = jnp.maximum(jnp.einsum("bsc,oc->bso", x, weight) + bias, 0.0)

    # f32 path with cached (prepared) params -- exact semantics of the module.
    w_t_f32, b2d = prepare_block_params(weight, bias, use_bf16_operands=False)
    y = block_apply(x, w_t_f32, b2d)
    y = jax.block_until_ready(y)
    assert y.shape == (batch, seq, channels)
    assert jnp.allclose(y, ref, atol=1e-5, rtol=1e-5), "f32 mismatch vs reference"

    # bf16-operand path (recommended on v5e/v6e/v7x), bf16 output, f32 accumulate.
    w_t_bf16, b2d_bf16 = prepare_block_params(weight, bias, use_bf16_operands=True)
    y_bf16 = block_apply(x, w_t_bf16, b2d_bf16, out_dtype=jnp.bfloat16)
    y_bf16 = jax.block_until_ready(y_bf16)
    assert y_bf16.dtype == jnp.bfloat16
    assert jnp.allclose(y_bf16.astype(jnp.float32), ref, atol=5e-2, rtol=5e-2), \
        "bf16 mismatch vs reference"

    print("KERNEL_OK")
</pallas_src>

<mosaic_0001>
module attributes {stable_mosaic.version = 11 : i64} {
  func.func @_block_kernel(%arg0: i32, %arg1: i32, %arg2: memref<8x128xf32, #tpu.memory_space<vmem>>, %arg3: memref<128x128xf32, #tpu.memory_space<vmem>>, %arg4: memref<1x128xf32, #tpu.memory_space<vmem>>, %arg5: memref<8x128xf32, #tpu.memory_space<vmem>>) attributes {dimension_semantics = [#tpu.dimension_semantics<parallel>, #tpu.dimension_semantics<parallel>], iteration_bounds = array<i64: 1, 2>, scalar_prefetch = 0 : i64, scratch_operands = 0 : i64, tpu.core_type = #tpu.core_type<tc>, window_params = [{transform_indices = @transform_0, window_bounds = array<i64: 8, 128>}, {pipeline_mode = #tpu.pipeline_mode<synchronous>, transform_indices = @transform_1, window_bounds = array<i64: 128, 128>}, {pipeline_mode = #tpu.pipeline_mode<synchronous>, transform_indices = @transform_2, window_bounds = array<i64: 1, 128>}, {transform_indices = @transform_3, window_bounds = array<i64: 8, 128>}]} {
    %c0 = arith.constant 0 : index
    %c0_0 = arith.constant 0 : index
    %0 = vector.load %arg2[%c0, %c0_0] : memref<8x128xf32, #tpu.memory_space<vmem>>, vector<8x128xf32>
    %c0_1 = arith.constant 0 : index
    %c0_2 = arith.constant 0 : index
    %1 = vector.load %arg3[%c0_1, %c0_2] : memref<128x128xf32, #tpu.memory_space<vmem>>, vector<128x128xf32>
    %cst = arith.constant dense<0.000000e+00> : vector<8x128xf32>
    %2 = tpu.matmul %0, %1, %cst {dimension_numbers = #tpu.dot_dimension_numbers<[1], [0], [0], [1], [0, 0, 1, 1], [], []>} : vector<8x128xf32>, vector<128x128xf32>, vector<8x128xf32> -> vector<8x128xf32>
    %c0_3 = arith.constant 0 : index
    %c0_4 = arith.constant 0 : index
    %3 = vector.load %arg4[%c0_3, %c0_4] : memref<1x128xf32, #tpu.memory_space<vmem>>, vector<1x128xf32>
    %4 = vector.broadcast %3 : vector<1x128xf32> to vector<8x128xf32>
    %5 = arith.addf %2, %4 : vector<8x128xf32>
    %cst_5 = arith.constant 0.000000e+00 : f32
    %6 = vector.broadcast %cst_5 : f32 to vector<8x128xf32>
    %7 = arith.maximumf %5, %6 : vector<8x128xf32>
    %c0_6 = arith.constant 0 : index
    %c0_7 = arith.constant 0 : index
    %8 = vector.load %arg5[%c0_6, %c0_7] : memref<8x128xf32, #tpu.memory_space<vmem>>, vector<8x128xf32>
    tpu.vector_store %arg5[%c0_6, %c0_7], %7 {strides = array<i32>} : memref<8x128xf32, #tpu.memory_space<vmem>>, vector<8x128xf32>,
    return
  }
  func.func @transform_0(%arg0: i32, %arg1: i32) -> (i32, i32) {
    %c0_i32 = arith.constant 0 : i32
    %c0_i32_0 = arith.constant 0 : i32
    return %arg1, %c0_i32 : i32, i32
  }
  func.func @transform_1(%arg0: i32, %arg1: i32) -> (i32, i32) {
    %c0_i32 = arith.constant 0 : i32
    %c0_i32_0 = arith.constant 0 : i32
    return %c0_i32, %arg0 : i32, i32
  }
  func.func @transform_2(%arg0: i32, %arg1: i32) -> (i32, i32) {
    %c0_i32 = arith.constant 0 : i32
    %c0_i32_0 = arith.constant 0 : i32
    return %c0_i32, %arg0 : i32, i32
  }
  func.func @transform_3(%arg0: i32, %arg1: i32) -> (i32, i32) {
    %c0_i32 = arith.constant 0 : i32
    return %arg1, %arg0 : i32, i32
  }
}

</mosaic_0001>

<bundles_post_ra>
// kernel: tpu_custom_call.1
= control target key start
LH: loop header
LB: loop body
LE: loop exit
PB: predicated region body
PF: predicated region fallthrough
CT: control target
= control target key end

     0   :  { %8 = vsyncpa [#allocation3], 0  ;;  %s1019_s0 = inlined_call_operand.hbm [shape: f32[16,128], index: 0, kind: input, shape index: {}]   ;;  %s1020_s1 = inlined_call_operand.hbm [shape: f32[128,128], index: 1, kind: input, shape index: {}]   ;;  %s1021_s2 = inlined_call_operand.vmem [shape: f32[1,128], index: 2, kind: input, shape index: {}]   ;;  %s1022_s3 = inlined_call_operand.hbm [shape: f32[16,128], index: 3, kind: output, shape index: {}]  }
   0x1   :  { %10 = vsyncpa [#allocation3 + $0x1], 0 }
   0x2   :  { %11 = vsyncpa [#allocation6], 0 }
   0x3   :  { %12 = vsyncpa [#allocation4], 0 }
   0x4   :  { %14 = vsyncpa [#allocation4 + $0x1], 0  ;;  %s795_s12 = smov 0   ;;  %s797_s13 = smov 0  }
   0x5   :  { %s799_s14 = smov 0   ;;  %s801_s15 = smov 0  }
   0x6   :  { %s803_s16 = smov 0   ;;  %s805_s17 = smov 0  }
   0x7 LB: > { %s450_s18 = sadd.s32 4294967295, %s765_s17   ;;  %s451_s19 = sadd.s32 4294967294, %s765_s17   ;;  %s765_s17 = sphi %s805_s17, %s20_s17   ;;  %s761_s16 = sphi %s803_s16, %s1046_s16   ;;  %s757_s15 = sphi %s801_s15, %s1045_s15   ;;  %s753_s14 = sphi %s799_s14, %s1044_s14   ;;  %s749_s13 = sphi %s797_s13, %s1043_s13   ;;  %s745_s12 = sphi %s795_s12, %s1042_s12  }
   0x8   : > { %p52_p0 = scmp.ne.s32.totalorder %s749_s13, %s745_s12  ;;  %p829_p1 = scmp.eq.s32.totalorder %s450_s18, 0 }
   0x9   : > { %p833_p2 = scmp.eq.s32.totalorder %s450_s18, 1  ;;  %p136_p3 = scmp.eq.s32.totalorder %s451_s19, 1 }
   0xa   : > { %s1027_s20 = scalar_select %p829_p1, 1, 0 }
   0xb   : > { %s1028_s21 = scalar_select %p833_p2, 1, 0 }
   0xc   : > { %p839_p4 = por %p829_p1, %p52_p0  ;;  %p452_p5 = scmp.ge.s32.totalorder %s765_s17, 1 }
   0xd   : > { %p844_p6 = por %p136_p3, %p52_p0  ;;  %p143_p7 = scmp.lt.s32.totalorder %s765_s17, 3 }
   0xe   : > { %s1029_s22 = scalar_select %p839_p4, 1, 0 }
   0xf   : > { %s1030_s23 = scalar_select %p844_p6, 1, 0 }
  0x10   : > { %p849_p8 = pnand %p452_p5, %p143_p7  ;;  %s767_s25 = smov [#allocation5]  }
  0x11   : > { %s157_s26 = sshll.u32 %s767_s25, 4  ;;  %s29_s28 = sadd.s32 1, %s761_s16  ;;  %s158_s26 = int_to_ptr.vmem [resolvable:$true] %s157_s26 }
  0x12   : > { %s1031_s24 = scalar_select %p849_p8, 1, 0 }
  0x13   : > { %p551_p9 = pneg %p849_p8  ;;  %s621_s4 = scalar_lea.hbm %s1020_s1, 2048 }
  0x14   : > { %p622_p12 = scmp.ne.s32.totalorder %s1020_s1, %s621_s4  ;;  %p628_p5 = scmp.lt.u32.totalorder %s621_s4, %s1020_s1 }
  0x15   : > { %p858_p11 = pnand %p551_p9, %p829_p1 }
  0x17   : > { %p623_p13 = pneg %p858_p11 }
  0x19   : > { %p624_p0 = pnand %p623_p13, %p622_p12 }
  0x1b   : > { %p625_p3 = pneg %p624_p0 }
  0x1d   : > { %p630_p7 = pnand %p628_p5, %p625_p3 }
  0x1f   : > { %633 = shalt.err (!%p630_p7)
}
  0x20   : > { %s634_s9 = scalar_lea.vmem %s158_s26, 2048  ;;  %p642_p1 = scmp.lt.s32.totalorder %s158_s26, %s158_s26 }
  0x21   : > { %p635_p9 = scmp.ne.s32.totalorder %s158_s26, %s634_s9  ;;  %p643_p4 = scmp.lt.s32.totalorder %s634_s9, %s634_s9 }
  0x23   : > { %p637_p10 = pnand %p635_p9, %p623_p13  ;;  %p644_p8 = por %p643_p4, %p642_p1 }
  0x25   : > { %p638_p6 = pneg %p637_p10 }
  0x27   : > { %p645_p2 = pnand %p644_p8, %p638_p6 }
  0x29   : > { %648 = shalt.err (!%p645_p2)
}
  0x2a   : > { %s768_s10 = smov 128   ;;  %s769_s11 = smov 8  }
  0x2b   : > { %554 = dma.hbm_to_vmem [thread:$0]  (!%p858_p11), %s1020_s1, 2048, %s158_s26, [#allocation6], %s768_s10, %s768_s10, %s769_s11  }
  0x2c   : > { %p30_p1 = scmp.ge.s32.totalorder %s29_s28, 2  ;;  %s39_s25 = sadd.s32 1, %s753_s14 }
  0x2d   : > { %p46_p2 = scmp.ne.s32.totalorder %s753_s14, %s749_s13  ;;  %p47_p4 = scmp.eq.s32.totalorder %s765_s17, 0 }
  0x2e   : > { %s1048_s28 = smov (%p30_p1, %s29_s28), 0  ;;  %p1034_p8 = scmp.ne.s32.totalorder %s1028_s21, 0 }
  0x2f   : > { %p885_p6 = por %p47_p4, %p46_p2  ;;  %s36_s27 = ssub.s32 %s761_s16, %s1048_s28 }
  0x30   : > { %p891_p10 = por %p1034_p8, %p46_p2  ;;  %p564_p12 = scmp.lt.s32.totalorder %s765_s17, 2 }
  0x31   : > { %p37_p11 = scmp.eq.s32.totalorder %s36_s27, 0  ;;  %s177_s26 = sand.u32 1, %s753_s14  }
  0x32   : > { %s456_s4 = sshll.u32 %s177_s26, 3  ;;  %s457_s6 = sshll.u32 %s761_s16, 7 }
  0x33   : > { %s900_s5 = scalar_select %p37_p11, %s753_s14, %s39_s25  }
  0x34   : > { %s906_s9 = scalar_lea.hbm %s1019_s0, %s457_s6  ;;  %s181_s21 = scalar_lea.vmem [#allocation2], %s456_s4 }
  0x35   : > { %s188_s10 = sshll.u32 %s181_s21, 4  ;;  %p912_p13 = pnand %p564_p12, %p885_p6  ;;  %s908_s10 = int_to_ptr.vmem [resolvable:$true] %s188_s10 }
  0x36   : > { %s178_s18 = scalar_lea.sflag [#allocation3], %s177_s26  ;;  %s649_s19 = scalar_lea.hbm %s906_s9, 128 }
  0x37   : > { %p650_p0 = scmp.ne.s32.totalorder %s906_s9, %s649_s19  ;;  %p651_p3 = pneg %p912_p13 }
  0x38   : > { %s654_s4 = scalar_lea.hbm %s1019_s0, 256  ;;  %p655_p9 = scmp.lt.u32.totalorder %s906_s9, %s1019_s0 }
  0x39   : > { %p652_p5 = pnand %p651_p3, %p650_p0  ;;  %p656_p1 = scmp.lt.u32.totalorder %s654_s4, %s649_s19 }
  0x3a   : > { %p658_p4 = scmp.lt.u32.totalorder %s649_s19, %s906_s9 }
  0x3b   : > { %p653_p7 = pneg %p652_p5  ;;  %p657_p2 = por %p656_p1, %p655_p9 }
  0x3d   : > { %p659_p6 = por %p658_p4, %p657_p2 }
  0x3f   : > { %p660_p8 = pnand %p659_p6, %p653_p7 }
  0x41   : > { %663 = shalt.err (!%p660_p8)
}
  0x42   : > { %s664_s26 = scalar_lea.vmem %s908_s10, 128  ;;  %s770_s7 = smov [#allocation2]  }
  0x43   : > { %p665_p12 = scmp.ne.s32.totalorder %s908_s10, %s664_s26  ;;  %s669_s8 = sshll.u32 %s770_s7, 4  ;;  %s670_s8 = int_to_ptr.vmem [resolvable:$false] %s669_s8 }
  0x44   : > { %s671_s21 = scalar_lea.vmem %s670_s8, 256  ;;  %p672_p5 = scmp.lt.s32.totalorder %s908_s10, %s670_s8 }
  0x45   : > { %p667_p11 = pnand %p665_p12, %p651_p3  ;;  %p673_p9 = scmp.lt.s32.totalorder %s671_s21, %s664_s26 }
  0x47   : > { %p668_p0 = pneg %p667_p11  ;;  %p674_p1 = por %p673_p9, %p672_p5 }
  0x49   : > { %p675_p2 = pnand %p674_p1, %p668_p0 }
  0x4b   : > { %678 = shalt.err (!%p675_p2)
}
  0x4c   : > { %558 = dma.hbm_to_vmem [thread:$0]  (!%p912_p13), %s906_s9, 128, %s908_s10, %s178_s18  }
  0x4d   : > { %p1037_p7 = scmp.ne.s32.totalorder %s1031_s24, 0 }
  0x4e   : > { %s944_s19 = sand.u32 (!%p1037_p7), 1, %s749_s13   ;;  %p1038_p3 = scmp.ne.s32.totalorder (!%p1037_p7), %s1029_s22, 0 }
  0x4f   : > { %197 = sbr.rel (%p1037_p7) target bundleno = 355 (0x163), region = 32  ;;  %s459_s25 = sshll.u32 (!%p1037_p7), %s944_s19, 3 }
  0x50   : > { %s200_s27 = scalar_lea.sflag (!%p1037_p7), [#allocation3], %s944_s19  ;;  %s950_s4 = scalar_lea.vmem (!%p1037_p7), [#allocation2], %s459_s25 }
  0x56   : > { %732 = dma.done.wait (%p1038_p3), %s200_s27, 128  }
  0x57   : > { %734 = vsyncadd (%p1038_p3), %s200_s27, 4294967168  ;;  %p1039_p13 = scmp.ne.s32.totalorder %s1027_s20, 0 }
  0x59   : > { %736 = dma.done.wait (%p1039_p13), [#allocation6], 2048  }
  0x5a   : > { %738 = vsyncadd (%p1039_p13), [#allocation6], 4294965248  ;;  %v771_v0 = vmov 0.0|0.0   ;;  %vm772_vm0 = vmmov 0   ;;  %v773_v1 = vmov 0.0   ;;  %v237_v2 = vld [vmem:[#allocation5] sm:$0xff] }
  0x5b   : > { %519 = vmatprep.subr.bf16.mxu0 %v771_v0  ;;  %516 = vmatprep.mubr.msk.f32.mxu0 %vm772_vm0, %v773_v1  ;;  %v238_v3 = vld [vmem:[#allocation5 + $0x8] sm:$0xff]  ;;  %v239_v4 = vld [vmem:[#allocation5 + $0x10] sm:$0xff]  ;;  %v240_v6 = vld [vmem:[#allocation5 + $0x18] sm:$0xff]  ;;  %s464_s24 = sshll.u32 %s757_s15, 7  ;;  %s232_s9 = scalar_lea.vmem [#allocation7], %s459_s25 }
  0x5c   : > { %v520_v5 = vpack.c.bf16 %v238_v3, %v237_v2  ;;  %v523_v7 = vpack.c.bf16 %v240_v6, %v239_v4  ;;  %v241_v8 = vld [vmem:[#allocation5 + $0x20] sm:$0xff]  ;;  %v242_v9 = vld [vmem:[#allocation5 + $0x28] sm:$0xff]  ;;  %v243_v11 = vld [vmem:[#allocation5 + $0x30] sm:$0xff]  ;;  %s347_s10 = sshll.u32 %s232_s9, 4  ;;  %s970_s29 = scalar_lea.hbm %s1022_s3, %s464_s24  ;;  %s972_s10 = int_to_ptr.vmem [resolvable:$true] %s347_s10 }
  0x5d   : > { %v526_v10 = vpack.c.bf16 %v242_v9, %v241_v8  ;;  %v244_v12 = vld [vmem:[#allocation5 + $0x38] sm:$0xff]  ;;  %v245_v14 = vld [vmem:[#allocation5 + $0x40] sm:$0xff]  ;;  %v246_v15 = vld [vmem:[#allocation5 + $0x48] sm:$0xff]  ;;  %s333_s6 = scalar_lea.sflag [#allocation4], %s944_s19  ;;  %s679_s26 = scalar_lea.vmem %s972_s10, 128 }
  0x5e   : > { %521 = vmatpush3.bf16.msra.mxu0 %v520_v5  ;;  %v529_v13 = vpack.c.bf16 %v244_v12, %v243_v11  ;;  %v532_v16 = vpack.c.bf16 %v246_v15, %v245_v14  ;;  %v247_v17 = vld [vmem:[#allocation5 + $0x50] sm:$0xff]  ;;  %v248_v18 = vld [vmem:[#allocation5 + $0x58] sm:$0xff]  ;;  %v249_v20 = vld [vmem:[#allocation5 + $0x60] sm:$0xff]  ;;  %p680_p4 = scmp.ne.s32.totalorder %s972_s10, %s679_s26  ;;  %s774_s15 = smov [#allocation7]  }
  0x5f   : > { %522 = vmatprep.subr.bf16.mxu0 %v771_v0  ;;  %v535_v19 = vpack.c.bf16 %v248_v18, %v247_v17  ;;  %v250_v21 = vld [vmem:[#allocation5 + $0x68] sm:$0xff]  ;;  %v251_v23 = vld [vmem:[#allocation5 + $0x70] sm:$0xff]  ;;  %v252_v24 = vld [vmem:[#allocation5 + $0x78] sm:$0xff]  ;;  %s683_s7 = sshll.u32 %s774_s15, 4  ;;  %s684_s7 = int_to_ptr.vmem [resolvable:$false] %s683_s7 }
  0x60   : > { %v538_v22 = vpack.c.bf16 %v250_v21, %v249_v20  ;;  %v541_v25 = vpack.c.bf16 %v252_v24, %v251_v23  ;;  %v236_v26 = vld [vmem:[%s950_s4] sm:$0xff]  ;;  %p681_p6 = pnand %p680_p4, %p891_p10  ;;  %s685_s8 = scalar_lea.vmem %s684_s7, 256 }
  0x61   : > { %v462_v27 = vld [vmem:[%s1021_s2] ss:$0 sm:$0xff]  ;;  %p686_p12 = scmp.lt.s32.totalorder %s972_s10, %s684_s7  ;;  %p687_p11 = scmp.lt.s32.totalorder %s685_s8, %s679_s26 }
  0x62   : > { %524 = vmatpush3.bf16.msra.mxu0 %v523_v7  ;;  %p682_p8 = pneg %p681_p6 }
  0x63   : > { %525 = vmatprep.subr.bf16.mxu0 %v771_v0  ;;  %p688_p0 = por %p687_p11, %p686_p12 }
  0x65   : > { %p689_p5 = pnand %p688_p0, %p682_p8 }
  0x66   : > { %527 = vmatpush3.bf16.msra.mxu0 %v526_v10 }
  0x67   : > { %528 = vmatprep.subr.bf16.mxu0 %v771_v0 }
  0x6a   : > { %530 = vmatpush3.bf16.msra.mxu0 %v529_v13 }
  0x6b   : > { %531 = vmatprep.subr.bf16.mxu0 %v771_v0 }
  0x6e   : > { %533 = vmatpush3.bf16.msra.mxu0 %v532_v16 }
  0x6f   : > { %534 = vmatprep.subr.bf16.mxu0 %v771_v0 }
  0x72   : > { %536 = vmatpush3.bf16.msra.mxu0 %v535_v19 }
  0x73   : > { %537 = vmatprep.subr.bf16.mxu0 %v771_v0 }
  0x76   : > { %539 = vmatpush3.bf16.msra.mxu0 %v538_v22 }
  0x77   : > { %540 = vmatprep.subr.bf16.mxu0 %v771_v0 }
  0x7a   : > { %542 = vmatpush3.bf16.msra.mxu0 %v541_v25 }
  0x7d   : > { %517 = vmatmul.mubr.f32.vlgmr.msra.gmra.mrb[0].mxu0 %v236_v26 }
 0x150   : > { %v326_v28 = vpop.f32.mrb[0].mxu0 }
 0x151   : > { %v327_v29 = vadd.f32 %v462_v27, %v326_v28  ;;  %v518_v30 = vpop.f32.mrb[1].mxu0 }
 0x153   : > { %v330_v31 = vmax.f32 %v327_v29, 0.0 }
 0x155   : > { %331 = vst [vmem:[%s232_s9] sm:$0xff] %v330_v31 }
 0x156   : > { %692 = shalt.err (!%p689_p5)
}
 0x157   : > { %s693_s21 = scalar_lea.hbm %s970_s29, 128  ;;  %s697_s27 = scalar_lea.hbm %s1022_s3, 256 }
 0x158   : > { %p694_p9 = scmp.ne.s32.totalorder %s970_s29, %s693_s21  ;;  %p698_p7 = scmp.lt.u32.totalorder %s970_s29, %s1022_s3 }
 0x159   : > { %p699_p3 = scmp.lt.u32.totalorder %s697_s27, %s693_s21  ;;  %p701_p4 = scmp.lt.u32.totalorder %s693_s21, %s970_s29 }
 0x15a   : > { %p695_p1 = pnand %p694_p9, %p891_p10 }
 0x15b   : > { %p700_p13 = por %p699_p3, %p698_p7 }
 0x15c   : > { %p696_p2 = pneg %p695_p1 }
 0x15d   : > { %p702_p6 = por %p701_p4, %p700_p13 }
 0x15f   : > { %p703_p8 = pnand %p702_p6, %p696_p2 }
 0x161   : > { %706 = shalt.err (!%p703_p8)
}
 0x162   : > { %549 = dma.vmem_to_hbm [thread:$0]  (%p891_p10), %s972_s10, 128, %s970_s29, %s333_s6  }
 0x163 PF: > { %s359_s22 = sand.u32 1, %s745_s12   ;;  %p1040_p12 = scmp.ne.s32.totalorder %s1030_s23, 0 }
 0x164   : > { %p1041_p11 = scmp.ge.s32.totalorder %s765_s17, 2  ;;  %s360_s24 = scalar_lea.sflag [#allocation4], %s359_s22 }
 0x166   : > { %p560_p0 = pnand %p1041_p11, %p1040_p12 }
 0x168   : > { %740 = dma.done.wait (!%p560_p0), %s360_s24, 128  }
 0x169   : > { %742 = vsyncadd (!%p560_p0), %s360_s24, 4294967168  ;;  %s20_s17 = sadd.s32 1, %s765_s17   ;;  %s1042_s12 = smov %s749_s13 }
 0x16a   : > { %p17_p5 = scmp.ge.s32.totalorder %s20_s17, 4   ;;  %s1043_s13 = smov %s753_s14 }
 0x16b   : > { %s1044_s14 = smov %s900_s5  ;;  %s1045_s15 = smov %s761_s16 }
 0x16c   : > { %s1046_s16 = smov %s1048_s28  ;;  %19 = sbr.rel (!%p17_p5) target bundleno = 7 (0x7), region = 85 }
 0x173   :  { %365 = vsyncpa [#allocation3], 1 }
 0x174   :  { %367 = vsyncpa [#allocation3 + $0x1], 1 }
 0x175   :  { %368 = vsyncpa [#allocation6], 1 }
 0x176   :  { %369 = vsyncpa [#allocation4], 1 }
 0x177   :  { %371 = vsyncpa [#allocation4 + $0x1], 1 }

</bundles_post_ra>
